<compile_context>
chip_gen: v7x
topology: tpu7x:2x2x1
jax: 0.10.0
libtpu: 0.0.40
codegen_flags: <defaults>
</compile_context>

<pallas_src>
import functools

import jax
import jax.numpy as jnp
from jax.experimental import pallas as pl
from jax.experimental.pallas import tpu as pltpu

# encoder: 33->32->32->16->16 (ReLU after each), decoder: 16->16->32->32->33 (ReLU after all but last)
LAYER_DIMS = [(33, 32), (32, 32), (32, 16), (16, 16),
              (16, 16), (16, 32), (32, 32), (32, 33)]
N_LAYERS = len(LAYER_DIMS)
IN_DIM = 33
OUT_DIM = 33
BIAS_ROW = 33          # row of the activation pinned at 1.0 (bias carrier)
PAD = 40               # feature padding (multiple of 8 sublanes; >= 34)


def _round_up(n, m):
    return ((n + m - 1) // m) * m


# ---------------------------------------------------------------------------
# Kernel
# ---------------------------------------------------------------------------
def _mlp_chain(w_ref, h):
    """h: (PAD, chunk) bf16 with row BIAS_ROW == 1.0. Returns (PAD, chunk) f32."""
    for i in range(N_LAYERS - 1):
        acc = jnp.dot(w_ref[i], h, preferred_element_type=jnp.float32)  # MXU, bias folded in
        h = jnp.maximum(acc, 0.0).astype(jnp.bfloat16)                  # ReLU keeps carrier at 1
    return jnp.dot(w_ref[N_LAYERS - 1], h, preferred_element_type=jnp.float32)


def _ae_kernel(x_ref, w_ref, o_ref, *, chunk, n_chunks):
    """x_ref: (PAD, bt) bf16; w_ref: (8, PAD, PAD) bf16 (bias folded); o_ref: (PAD, bt) f32."""
    if n_chunks == 1:
        o_ref[...] = _mlp_chain(w_ref, x_ref[...])
    else:
        def body(c, carry):
            off = pl.multiple_of(c * chunk, chunk)
            o_ref[:, pl.ds(off, chunk)] = _mlp_chain(w_ref, x_ref[:, pl.ds(off, chunk)])
            return carry
        jax.lax.fori_loop(0, n_chunks, body, None, unroll=n_chunks <= 4)


# ---------------------------------------------------------------------------
# Parameter packing (do this ONCE per set of weights, outside the per-call path)
# ---------------------------------------------------------------------------
def pack_params(weights, biases):
    """weights[i]: (out_i, in_i) f32 (nn.Linear layout); biases[i]: (out_i,) f32.

    Returns (8, PAD, PAD) bf16 with the bias in column BIAS_ROW and a 1 at
    [BIAS_ROW, BIAS_ROW] so the ones-row propagates through every layer.
    """
    w = jnp.zeros((N_LAYERS, PAD, PAD), jnp.float32)
    for i, (din, dout) in enumerate(LAYER_DIMS):
        w = w.at[i, :dout, :din].set(weights[i])
        w = w.at[i, :dout, BIAS_ROW].set(biases[i].reshape(-1))
        w = w.at[i, BIAS_ROW, BIAS_ROW].set(1.0)
    return w.astype(jnp.bfloat16)


# ---------------------------------------------------------------------------
# Tile selection
# ---------------------------------------------------------------------------
def _choose_tiles(B, max_tile):
    max_tile = max(128, _round_up(int(max_tile), 128))
    n_tiles = max(1, pl.cdiv(B, max_tile))
    # Feed both TensorCores on v7x: at least 2 grid steps once there is enough work.
    if B > 128 and n_tiles < 2:
        n_tiles = 2
    bt = _round_up(pl.cdiv(B, n_tiles), 128)     # lane axis => multiple of 128
    b_pad = _round_up(B, bt)
    # Inner compute chunk: largest 128-multiple divisor of bt that is <= 512.
    chunk = 128
    for c in range(min(512, bt), 127, -128):
        if bt % c == 0:
            chunk = c
            break
    return bt, b_pad, chunk


# ---------------------------------------------------------------------------
# Forward wrapper
# ---------------------------------------------------------------------------
def intphys_ae_forward(x, w_packed, *, max_batch_tile=2048):
    """x: (B, 33) float32. w_packed: (8, PAD, PAD) bf16 from pack_params(). Returns (B, 33) f32."""
    B, f_in = x.shape
    assert f_in == IN_DIM
    bt, b_pad, chunk = _choose_tiles(B, max_batch_tile)
    n_chunks = bt // chunk
    grid = (b_pad // bt,)

    # Layout plumbing (pure data movement, done by XLA outside the kernel):
    # bf16 cast, append the bias-carrier column of ones, zero-pad features to PAD and
    # batch to b_pad, then transpose so batch lands on the lane axis.
    x_bf16 = x.astype(jnp.bfloat16)
    ones = jnp.ones((B, 1), jnp.bfloat16)
    x_aug = jnp.concatenate([x_bf16, ones], axis=1)                    # (B, 34)
    x_aug = jnp.pad(x_aug, ((0, b_pad - B), (0, PAD - IN_DIM - 1)))    # (b_pad, PAD)
    xT = x_aug.T                                                       # (PAD, b_pad) bf16

    kernel = functools.partial(_ae_kernel, chunk=chunk, n_chunks=n_chunks)

    outT = pl.pallas_call(
        kernel,
        out_shape=jax.ShapeDtypeStruct((PAD, b_pad), jnp.float32),
        grid_spec=pltpu.PrefetchScalarGridSpec(
            num_scalar_prefetch=0,
            grid=grid,
            in_specs=[
                # Activations: batch tiled along the lane axis.
                pl.BlockSpec((PAD, bt), lambda i: (0, i)),
                # Packed params: one full block, resident across all grid steps (~13 KB).
                pl.BlockSpec((N_LAYERS, PAD, PAD), lambda i: (0, 0, 0)),
            ],
            out_specs=pl.BlockSpec((PAD, bt), lambda i: (0, i)),
        ),
        compiler_params=pltpu.CompilerParams(
            # Batch-tile axis is independent work -> shards across TCs on v7x.
            dimension_semantics=("parallel",),
            # Footprint is ~1-2 MiB; the default scoped-VMEM limit is plenty on v5e/v6e/v7x.
        ),
    )(xT, w_packed)

    return outT[:OUT_DIM, :B].T                                        # (B, 33) f32


# ---------------------------------------------------------------------------
# Reference implementations & synthetic init
# ---------------------------------------------------------------------------
def init_params(key):
    """PyTorch-like uniform(-1/sqrt(fan_in), 1/sqrt(fan_in)); weights in (out, in) layout."""
    weights, biases = [], []
    for (din, dout) in LAYER_DIMS:
        key, kw, kb = jax.random.split(key, 3)
        bound = 1.0 / jnp.sqrt(jnp.float32(din))
        weights.append(jax.random.uniform(kw, (dout, din), jnp.float32, -bound, bound))
        biases.append(jax.random.uniform(kb, (dout,), jnp.float32, -bound, bound))
    return weights, biases


def reference_forward_bf16(x, weights, biases):
    """Mirrors the kernel's math: bf16 operands (incl. bias), f32 accumulation."""
    h = x.astype(jnp.bfloat16)
    for i in range(N_LAYERS):
        acc = jnp.dot(h, weights[i].astype(jnp.bfloat16).T,
                      preferred_element_type=jnp.float32)
        acc = acc + biases[i].astype(jnp.bfloat16).astype(jnp.float32)
        if i < N_LAYERS - 1:
            h = jnp.maximum(acc, 0.0).astype(jnp.bfloat16)
        else:
            h = acc
    return h


def reference_forward_f32(x, weights, biases):
    h = x
    for i in range(N_LAYERS):
        h = h @ weights[i].T + biases[i]
        if i < N_LAYERS - 1:
            h = jnp.maximum(h, 0.0)
    return h


# ---------------------------------------------------------------------------
if __name__ == "__main__":
    key = jax.random.PRNGKey(0)
    key, kx = jax.random.split(key)

    weights, biases = init_params(key)
    w_packed = jax.block_until_ready(pack_params(weights, biases))  # packed once, reused

    fwd = jax.jit(intphys_ae_forward)

    # Small batch: single 128-lane tile, single grid step.
    B = 8
    x = jax.random.normal(kx, (B, 33), jnp.float32)
    out = jax.block_until_ready(fwd(x, w_packed))
    assert out.shape == (B, 33)
    ref_bf16 = reference_forward_bf16(x, weights, biases)
    ref_f32 = reference_forward_f32(x, weights, biases)
    assert jnp.allclose(out, ref_bf16, atol=2e-3, rtol=2e-2), "mismatch vs bf16 reference"
    assert float(jnp.max(jnp.abs(out - ref_f32))) < 0.1, "mismatch vs f32 reference"

    # Larger batch: 2 grid steps of 256 lanes each (exercises tiling, inner chunks,
    # remainder padding, and keeps both v7x TensorCores busy).
    B2 = 300
    x2 = jax.random.normal(jax.random.PRNGKey(1), (B2, 33), jnp.float32)
    out2 = jax.block_until_ready(fwd(x2, w_packed))
    assert out2.shape == (B2, 33)
    ref2_bf16 = reference_forward_bf16(x2, weights, biases)
    ref2_f32 = reference_forward_f32(x2, weights, biases)
    assert jnp.allclose(out2, ref2_bf16, atol=2e-3, rtol=2e-2), "mismatch vs bf16 reference (tiled)"
    assert float(jnp.max(jnp.abs(out2 - ref2_f32))) < 0.1, "mismatch vs f32 reference (tiled)"

    print("KERNEL_OK")
</pallas_src>

<mosaic_0001>
module attributes {stable_mosaic.version = 11 : i64} {
  func.func @_ae_kernel(%arg0: i32, %arg1: memref<40x128xbf16, #tpu.memory_space<vmem>>, %arg2: memref<8x40x40xbf16, #tpu.memory_space<vmem>>, %arg3: memref<40x128xf32, #tpu.memory_space<vmem>>) attributes {dimension_semantics = [#tpu.dimension_semantics<parallel>], iteration_bounds = array<i64: 1>, scalar_prefetch = 0 : i64, scratch_operands = 0 : i64, tpu.core_type = #tpu.core_type<tc>, window_params = [{transform_indices = @transform_0, window_bounds = array<i64: 40, 128>}, {pipeline_mode = #tpu.pipeline_mode<synchronous>, transform_indices = @transform_1, window_bounds = array<i64: 8, 40, 40>}, {transform_indices = @transform_2, window_bounds = array<i64: 40, 128>}]} {
    %c0 = arith.constant 0 : index
    %c0_0 = arith.constant 0 : index
    %0 = vector.load %arg1[%c0, %c0_0] : memref<40x128xbf16, #tpu.memory_space<vmem>>, vector<40x128xbf16>
    %c0_1 = arith.constant 0 : index
    %c0_2 = arith.constant 0 : index
    %c0_3 = arith.constant 0 : index
    %1 = vector.load %arg2[%c0_1, %c0_2, %c0_3] : memref<8x40x40xbf16, #tpu.memory_space<vmem>>, vector<1x40x40xbf16>
    %2 = vector.shape_cast %1 : vector<1x40x40xbf16> to vector<40x40xbf16>
    %cst = arith.constant dense<0.000000e+00> : vector<40x128xf32>
    %3 = tpu.matmul %2, %0, %cst {dimension_numbers = #tpu.dot_dimension_numbers<[1], [0], [0], [1], [0, 0, 1, 1], [], []>} : vector<40x40xbf16>, vector<40x128xbf16>, vector<40x128xf32> -> vector<40x128xf32>
    %cst_4 = arith.constant 0.000000e+00 : f32
    %4 = vector.broadcast %cst_4 : f32 to vector<40x128xf32>
    %5 = arith.maximumf %3, %4 : vector<40x128xf32>
    %6 = arith.truncf %5 : vector<40x128xf32> to vector<40x128xbf16>
    %c1 = arith.constant 1 : index
    %c0_5 = arith.constant 0 : index
    %c0_6 = arith.constant 0 : index
    %7 = vector.load %arg2[%c1, %c0_5, %c0_6] : memref<8x40x40xbf16, #tpu.memory_space<vmem>>, vector<1x40x40xbf16>
    %8 = vector.shape_cast %7 : vector<1x40x40xbf16> to vector<40x40xbf16>
    %cst_7 = arith.constant dense<0.000000e+00> : vector<40x128xf32>
    %9 = tpu.matmul %8, %6, %cst_7 {dimension_numbers = #tpu.dot_dimension_numbers<[1], [0], [0], [1], [0, 0, 1, 1], [], []>} : vector<40x40xbf16>, vector<40x128xbf16>, vector<40x128xf32> -> vector<40x128xf32>
    %cst_8 = arith.constant 0.000000e+00 : f32
    %10 = vector.broadcast %cst_8 : f32 to vector<40x128xf32>
    %11 = arith.maximumf %9, %10 : vector<40x128xf32>
    %12 = arith.truncf %11 : vector<40x128xf32> to vector<40x128xbf16>
    %c2 = arith.constant 2 : index
    %c0_9 = arith.constant 0 : index
    %c0_10 = arith.constant 0 : index
    %13 = vector.load %arg2[%c2, %c0_9, %c0_10] : memref<8x40x40xbf16, #tpu.memory_space<vmem>>, vector<1x40x40xbf16>
    %14 = vector.shape_cast %13 : vector<1x40x40xbf16> to vector<40x40xbf16>
    %cst_11 = arith.constant dense<0.000000e+00> : vector<40x128xf32>
    %15 = tpu.matmul %14, %12, %cst_11 {dimension_numbers = #tpu.dot_dimension_numbers<[1], [0], [0], [1], [0, 0, 1, 1], [], []>} : vector<40x40xbf16>, vector<40x128xbf16>, vector<40x128xf32> -> vector<40x128xf32>
    %cst_12 = arith.constant 0.000000e+00 : f32
    %16 = vector.broadcast %cst_12 : f32 to vector<40x128xf32>
    %17 = arith.maximumf %15, %16 : vector<40x128xf32>
    %18 = arith.truncf %17 : vector<40x128xf32> to vector<40x128xbf16>
    %c3 = arith.constant 3 : index
    %c0_13 = arith.constant 0 : index
    %c0_14 = arith.constant 0 : index
    %19 = vector.load %arg2[%c3, %c0_13, %c0_14] : memref<8x40x40xbf16, #tpu.memory_space<vmem>>, vector<1x40x40xbf16>
    %20 = vector.shape_cast %19 : vector<1x40x40xbf16> to vector<40x40xbf16>
    %cst_15 = arith.constant dense<0.000000e+00> : vector<40x128xf32>
    %21 = tpu.matmul %20, %18, %cst_15 {dimension_numbers = #tpu.dot_dimension_numbers<[1], [0], [0], [1], [0, 0, 1, 1], [], []>} : vector<40x40xbf16>, vector<40x128xbf16>, vector<40x128xf32> -> vector<40x128xf32>
    %cst_16 = arith.constant 0.000000e+00 : f32
    %22 = vector.broadcast %cst_16 : f32 to vector<40x128xf32>
    %23 = arith.maximumf %21, %22 : vector<40x128xf32>
    %24 = arith.truncf %23 : vector<40x128xf32> to vector<40x128xbf16>
    %c4 = arith.constant 4 : index
    %c0_17 = arith.constant 0 : index
    %c0_18 = arith.constant 0 : index
    %25 = vector.load %arg2[%c4, %c0_17, %c0_18] : memref<8x40x40xbf16, #tpu.memory_space<vmem>>, vector<1x40x40xbf16>
    %26 = vector.shape_cast %25 : vector<1x40x40xbf16> to vector<40x40xbf16>
    %cst_19 = arith.constant dense<0.000000e+00> : vector<40x128xf32>
    %27 = tpu.matmul %26, %24, %cst_19 {dimension_numbers = #tpu.dot_dimension_numbers<[1], [0], [0], [1], [0, 0, 1, 1], [], []>} : vector<40x40xbf16>, vector<40x128xbf16>, vector<40x128xf32> -> vector<40x128xf32>
    %cst_20 = arith.constant 0.000000e+00 : f32
    %28 = vector.broadcast %cst_20 : f32 to vector<40x128xf32>
    %29 = arith.maximumf %27, %28 : vector<40x128xf32>
    %30 = arith.truncf %29 : vector<40x128xf32> to vector<40x128xbf16>
    %c5 = arith.constant 5 : index
    %c0_21 = arith.constant 0 : index
    %c0_22 = arith.constant 0 : index
    %31 = vector.load %arg2[%c5, %c0_21, %c0_22] : memref<8x40x40xbf16, #tpu.memory_space<vmem>>, vector<1x40x40xbf16>
    %32 = vector.shape_cast %31 : vector<1x40x40xbf16> to vector<40x40xbf16>
    %cst_23 = arith.constant dense<0.000000e+00> : vector<40x128xf32>
    %33 = tpu.matmul %32, %30, %cst_23 {dimension_numbers = #tpu.dot_dimension_numbers<[1], [0], [0], [1], [0, 0, 1, 1], [], []>} : vector<40x40xbf16>, vector<40x128xbf16>, vector<40x128xf32> -> vector<40x128xf32>
    %cst_24 = arith.constant 0.000000e+00 : f32
    %34 = vector.broadcast %cst_24 : f32 to vector<40x128xf32>
    %35 = arith.maximumf %33, %34 : vector<40x128xf32>
    %36 = arith.truncf %35 : vector<40x128xf32> to vector<40x128xbf16>
    %c6 = arith.constant 6 : index
    %c0_25 = arith.constant 0 : index
    %c0_26 = arith.constant 0 : index
    %37 = vector.load %arg2[%c6, %c0_25, %c0_26] : memref<8x40x40xbf16, #tpu.memory_space<vmem>>, vector<1x40x40xbf16>
    %38 = vector.shape_cast %37 : vector<1x40x40xbf16> to vector<40x40xbf16>
    %cst_27 = arith.constant dense<0.000000e+00> : vector<40x128xf32>
    %39 = tpu.matmul %38, %36, %cst_27 {dimension_numbers = #tpu.dot_dimension_numbers<[1], [0], [0], [1], [0, 0, 1, 1], [], []>} : vector<40x40xbf16>, vector<40x128xbf16>, vector<40x128xf32> -> vector<40x128xf32>
    %cst_28 = arith.constant 0.000000e+00 : f32
    %40 = vector.broadcast %cst_28 : f32 to vector<40x128xf32>
    %41 = arith.maximumf %39, %40 : vector<40x128xf32>
    %42 = arith.truncf %41 : vector<40x128xf32> to vector<40x128xbf16>
    %c7 = arith.constant 7 : index
    %c0_29 = arith.constant 0 : index
    %c0_30 = arith.constant 0 : index
    %43 = vector.load %arg2[%c7, %c0_29, %c0_30] : memref<8x40x40xbf16, #tpu.memory_space<vmem>>, vector<1x40x40xbf16>
    %44 = vector.shape_cast %43 : vector<1x40x40xbf16> to vector<40x40xbf16>
    %cst_31 = arith.constant dense<0.000000e+00> : vector<40x128xf32>
    %45 = tpu.matmul %44, %42, %cst_31 {dimension_numbers = #tpu.dot_dimension_numbers<[1], [0], [0], [1], [0, 0, 1, 1], [], []>} : vector<40x40xbf16>, vector<40x128xbf16>, vector<40x128xf32> -> vector<40x128xf32>
    %c0_32 = arith.constant 0 : index
    %c0_33 = arith.constant 0 : index
    %46 = vector.load %arg3[%c0_32, %c0_33] : memref<40x128xf32, #tpu.memory_space<vmem>>, vector<40x128xf32>
    tpu.vector_store %arg3[%c0_32, %c0_33], %45 {strides = array<i32>} : memref<40x128xf32, #tpu.memory_space<vmem>>, vector<40x128xf32>,
    return
  }
  func.func @transform_0(%arg0: i32) -> (i32, i32) {
    %c0_i32 = arith.constant 0 : i32
    %c0_i32_0 = arith.constant 0 : i32
    return %c0_i32, %arg0 : i32, i32
  }
  func.func @transform_1(%arg0: i32) -> (i32, i32, i32) {
    %c0_i32 = arith.constant 0 : i32
    %c0_i32_0 = arith.constant 0 : i32
    %c0_i32_1 = arith.constant 0 : i32
    %c0_i32_2 = arith.constant 0 : i32
    return %c0_i32, %c0_i32_0, %c0_i32_1 : i32, i32, i32
  }
  func.func @transform_2(%arg0: i32) -> (i32, i32) {
    %c0_i32 = arith.constant 0 : i32
    %c0_i32_0 = arith.constant 0 : i32
    return %c0_i32, %arg0 : i32, i32
  }
}

</mosaic_0001>

<bundles_post_ra>
// kernel: intphys_ae_forward.1
= control target key start
LH: loop header
LB: loop body
LE: loop exit
PB: predicated region body
PF: predicated region fallthrough
CT: control target
= control target key end

     0   :  { %7 = vsyncpa [#allocation3], 0  ;;  %s1108_s9 = smov [#allocation2]   ;;  %s1268_s0 = inlined_call_operand.vmem [shape: bf16[40,128], index: 0, kind: input, shape index: {}]   ;;  %s1269_s1 = inlined_call_operand.hbm [shape: bf16[8,40,40], index: 1, kind: input, shape index: {}]   ;;  %s1270_s2 = inlined_call_operand.vmem [shape: f32[40,128], index: 2, kind: output, shape index: {}]  }
   0x1   :  { %s15_s10 = sshll.u32 %s1108_s9, 4  ;;  %s1084_s13 = scalar_lea.hbm %s1269_s1, 2560  ;;  %s16_s10 = int_to_ptr.vmem [resolvable:$true] %s15_s10 }
   0x2   :  { %p1085_p0 = scmp.ne.s32.totalorder %s1269_s1, %s1084_s13  ;;  %p1088_p1 = scmp.lt.u32.totalorder %s1084_s13, %s1269_s1 }
   0x4   :  { %p1090_p2 = pnand %p1088_p1, %p1085_p0 }
   0x6   :  { %1093 = shalt.err (!%p1090_p2)
}
   0x7   :  { %s1094_s18 = scalar_lea.vmem %s16_s10, 2560  ;;  %p1099_p4 = scmp.lt.s32.totalorder %s16_s10, %s16_s10 }
   0x8   :  { %p1095_p3 = scmp.ne.s32.totalorder %s16_s10, %s1094_s18  ;;  %p1100_p5 = scmp.lt.s32.totalorder %s1094_s18, %s1094_s18 }
   0xa   :  { %p1101_p6 = por %p1100_p5, %p1099_p4 }
   0xc   :  { %p1102_p7 = pnand %p1101_p6, %p1095_p3 }
   0xe   :  { %1105 = shalt.err (!%p1102_p7)
}
   0xf   :  { %s1109_s19 = smov 64   ;;  %s1110_s20 = smov 4  }
  0x10   :  { %21 = dma.hbm_to_vmem [thread:$0]  %s1269_s1, 2560, %s16_s10, [#allocation3], %s1109_s19, %s1109_s19, %s1110_s20  }
  0x11   :  { %1106 = dma.done.wait [#allocation3], 2560  }
  0x12   :  { %1107 = vsyncadd [#allocation3], 4294964736  ;;  %v1111_v0 = vmov 0.0   ;;  %vm1112_vm0 = vmmov 0   ;;  %v1057_v1 = vld [vmem:[%s1268_s0] sm:$0xff]   ;;  %v1058_v2 = vld [vmem:[%s1268_s0 + $0x8] sm:$0xff]  }
  0x13   :  { %908 = vmatprep.subr.bf16.mxu0 %v1111_v0  ;;  %914 = vmatprep.mubr.msk.bf16.mxu0 %vm1112_vm0, %v1111_v0  ;;  %vm74_vm1 = vcmask 1043456   ;;  %v1059_v3 = vld [vmem:[%s1268_s0 + $0x10] ss:$0 sps:$4 sm:$0xff]   ;;  %vm64_vm2 = vcmask 326656   ;;  %v1060_v5 = vld [vmem:[#allocation2] sm:$0xff]   ;;  %v1061_v6 = vld [vmem:[#allocation2 + $0x8] sm:$0xff]  }
  0x14   :  { %926 = vmatprep.subr.bf16.mxu1 %v1111_v0  ;;  %932 = vmatprep.mubr.msk.bf16.mxu1 %vm1112_vm0, %v1111_v0  ;;  %v76_v4 = vsel %vm74_vm1, %v1059_v3, 0  ;;  %v1062_v7 = vld [vmem:[#allocation2 + $0x10] ss:$0 sps:$4 sm:$0xff]   ;;  %v1063_v29 = vld [vmem:[#allocation2 + $0x14] sm:$0xff]   ;;  %v1064_v30 = vld [vmem:[#allocation2 + $0x1c] sm:$0xff]  }
  0x15   :  { %909 = vmatpush3.bf16.msra.mxu0 %v1057_v1  ;;  %v1065_v31 = vld [vmem:[#allocation2 + $0x24] ss:$0 sps:$4 sm:$0xff]   ;;  %v1066_v53 = vld [vmem:[#allocation2 + $0x28] sm:$0xff]   ;;  %v1067_v54 = vld [vmem:[#allocation2 + $0x30] sm:$0xff]  }
  0x16   :  { %910 = vmatprep.subr.bf16.mxu0 %v1111_v0  ;;  %v1068_v55 = vld [vmem:[#allocation2 + $0x38] ss:$0 sps:$4 sm:$0xff]  }
  0x19   :  { %911 = vmatpush3.bf16.msra.mxu0 %v1058_v2 }
  0x1a   :  { %912 = vmatprep.subr.bf16.mxu0 %v1111_v0 }
  0x1d   :  { %913 = vmatpush3.bf16.msra.mxu0 %v76_v4 }
  0x1e   :  { %944 = vmatprep.subr.bf16.mxu0 %v1111_v0 }
  0x20   :  { %915 = vmatmul.mubr.msk.bf16.vlgmr.msra.gmra.mrb[0].mxu0 %vm64_vm2, %v1060_v5 }
  0x21   :  { %918 = vmatprep.mubr.msk.bf16.mxu0 %vm1112_vm0, %v1111_v0 }
  0x28   :  { %919 = vmatmul.mubr.msk.bf16.gmra.mrb[4].mxu0 %vm64_vm2, %v1061_v6 }
  0x29   :  { %922 = vmatprep.mubr.msk.bf16.mxu0 %vm1112_vm0, %v1111_v0 }
  0x30   :  { %923 = vmatmul.mubr.msk.bf16.gmra.mrb[8].mxu0 %vm64_vm2, %v1062_v7 }
  0x31   :  { %950 = vmatprep.mubr.msk.bf16.mxu0 %vm1112_vm0, %v1111_v0 }
  0xf3   :  { %v112_v8 = vpop.f32.mrb[0].mxu0 }
  0xf4   :  { %v916_v9 = vpop.f32.mrb[1].mxu0  ;;  %v134_v11 = vmax.f32 %v112_v8, 0.0 }
  0xf5   :  { %v115_v10 = vpop.f32.mrb[2].mxu0 }
  0xf6   :  { %v135_v12 = vmax.f32 %v115_v10, 0.0  ;;  %v917_v13 = vpop.f32.mrb[3].mxu0 }
  0xf8   :  { %v139_v14 = vpack.c.bf16 %v135_v12, %v134_v11 }
  0xfa   :  { %927 = vmatpush3.bf16.msra.mxu1 %v139_v14  ;;  %v1069_v14 = vld [vmem:[#allocation2 + $0x3c] sm:$0xff]  }
  0xfb   :  { %v120_v15 = vpop.f32.mrb[4].mxu0  ;;  %928 = vmatprep.subr.bf16.mxu1 %v1111_v0 }
  0xfc   :  { %v920_v16 = vpop.f32.mrb[5].mxu0  ;;  %v136_v18 = vmax.f32 %v120_v15, 0.0  ;;  %v1070_v15 = vld [vmem:[#allocation2 + $0x44] sm:$0xff]  }
  0xfd   :  { %v123_v17 = vpop.f32.mrb[6].mxu0  ;;  %v1071_v16 = vld [vmem:[#allocation2 + $0x4c] ss:$0 sps:$4 sm:$0xff]  }
  0xfe   :  { %v137_v19 = vmax.f32 %v123_v17, 0.0  ;;  %v921_v20 = vpop.f32.mrb[7].mxu0 }
 0x100   :  { %v140_v21 = vpack.c.bf16 %v137_v19, %v136_v18 }
 0x102   :  { %929 = vmatpush3.bf16.msra.mxu1 %v140_v21 }
 0x103   :  { %v128_v22 = vpop.f32.mrb[8].mxu0  ;;  %930 = vmatprep.subr.bf16.mxu1 %v1111_v0 }
 0x104   :  { %v138_v23 = vmax.f32 %v128_v22, 0.0  ;;  %v924_v24 = vpop.f32.mrb[9].mxu0 }
 0x105   :  { %v131_v25 = vpop.f32.mrb[10].mxu0 }
 0x106   :  { %v141_v26 = vpack.c.bf16 %v138_v23, %v138_v23  ;;  %v925_v27 = vpop.f32.mrb[11].mxu0 }
 0x108   :  { %v171_v28 = vsel %vm74_vm1, %v141_v26, 0 }
 0x109   :  { %931 = vmatpush3.bf16.msra.mxu1 %v171_v28 }
 0x10a   :  { %962 = vmatprep.subr.bf16.mxu1 %v1111_v0 }
 0x10c   :  { %933 = vmatmul.mubr.msk.bf16.vlgmr.msra.gmra.mrb[0].mxu1 %vm64_vm2, %v1063_v29 }
 0x10d   :  { %936 = vmatprep.mubr.msk.bf16.mxu1 %vm1112_vm0, %v1111_v0 }
 0x114   :  { %937 = vmatmul.mubr.msk.bf16.gmra.mrb[4].mxu1 %vm64_vm2, %v1064_v30 }
 0x115   :  { %940 = vmatprep.mubr.msk.bf16.mxu1 %vm1112_vm0, %v1111_v0 }
 0x11c   :  { %941 = vmatmul.mubr.msk.bf16.gmra.mrb[8].mxu1 %vm64_vm2, %v1065_v31 }
 0x11d   :  { %968 = vmatprep.mubr.msk.bf16.mxu1 %vm1112_vm0, %v1111_v0 }
 0x1df   :  { %v207_v32 = vpop.f32.mrb[0].mxu1 }
 0x1e0   :  { %v934_v33 = vpop.f32.mrb[1].mxu1  ;;  %v229_v35 = vmax.f32 %v207_v32, 0.0 }
 0x1e1   :  { %v210_v34 = vpop.f32.mrb[2].mxu1 }
 0x1e2   :  { %v230_v36 = vmax.f32 %v210_v34, 0.0  ;;  %v935_v37 = vpop.f32.mrb[3].mxu1 }
 0x1e4   :  { %v234_v38 = vpack.c.bf16 %v230_v36, %v229_v35 }
 0x1e6   :  { %945 = vmatpush3.bf16.msra.mxu0 %v234_v38  ;;  %v1072_v38 = vld [vmem:[#allocation2 + $0x50] sm:$0xff]  }
 0x1e7   :  { %v215_v39 = vpop.f32.mrb[4].mxu1  ;;  %946 = vmatprep.subr.bf16.mxu0 %v1111_v0 }
 0x1e8   :  { %v938_v40 = vpop.f32.mrb[5].mxu1  ;;  %v231_v42 = vmax.f32 %v215_v39, 0.0  ;;  %v1073_v39 = vld [vmem:[#allocation2 + $0x58] sm:$0xff]  }
 0x1e9   :  { %v218_v41 = vpop.f32.mrb[6].mxu1  ;;  %v1074_v40 = vld [vmem:[#allocation2 + $0x60] ss:$0 sps:$4 sm:$0xff]  }
 0x1ea   :  { %v232_v43 = vmax.f32 %v218_v41, 0.0  ;;  %v939_v44 = vpop.f32.mrb[7].mxu1 }
 0x1ec   :  { %v235_v45 = vpack.c.bf16 %v232_v43, %v231_v42 }
 0x1ee   :  { %947 = vmatpush3.bf16.msra.mxu0 %v235_v45 }
 0x1ef   :  { %v223_v46 = vpop.f32.mrb[8].mxu1  ;;  %948 = vmatprep.subr.bf16.mxu0 %v1111_v0 }
 0x1f0   :  { %v233_v47 = vmax.f32 %v223_v46, 0.0  ;;  %v942_v48 = vpop.f32.mrb[9].mxu1 }
 0x1f1   :  { %v226_v49 = vpop.f32.mrb[10].mxu1 }
 0x1f2   :  { %v236_v50 = vpack.c.bf16 %v233_v47, %v233_v47  ;;  %v943_v51 = vpop.f32.mrb[11].mxu1 }
 0x1f4   :  { %v266_v52 = vsel %vm74_vm1, %v236_v50, 0 }
 0x1f5   :  { %949 = vmatpush3.bf16.msra.mxu0 %v266_v52 }
 0x1f6   :  { %980 = vmatprep.subr.bf16.mxu0 %v1111_v0 }
 0x1f8   :  { %951 = vmatmul.mubr.msk.bf16.vlgmr.msra.gmra.mrb[12].mxu0 %vm64_vm2, %v1066_v53 }
 0x1f9   :  { %954 = vmatprep.mubr.msk.bf16.mxu0 %vm1112_vm0, %v1111_v0 }
 0x200   :  { %955 = vmatmul.mubr.msk.bf16.gmra.mrb[16].mxu0 %vm64_vm2, %v1067_v54 }
 0x201   :  { %958 = vmatprep.mubr.msk.bf16.mxu0 %vm1112_vm0, %v1111_v0 }
 0x208   :  { %959 = vmatmul.mubr.msk.bf16.gmra.mrb[20].mxu0 %vm64_vm2, %v1068_v55 }
 0x209   :  { %986 = vmatprep.mubr.msk.bf16.mxu0 %vm1112_vm0, %v1111_v0 }
 0x2cb   :  { %v302_v56 = vpop.f32.mrb[12].mxu0 }
 0x2cc   :  { %v952_v57 = vpop.f32.mrb[13].mxu0  ;;  %v324_v59 = vmax.f32 %v302_v56, 0.0 }
 0x2cd   :  { %v305_v58 = vpop.f32.mrb[14].mxu0 }
 0x2ce   :  { %v325_v60 = vmax.f32 %v305_v58, 0.0  ;;  %v953_v61 = vpop.f32.mrb[15].mxu0 }
 0x2d0   :  { %v329_v62 = vpack.c.bf16 %v325_v60, %v324_v59 }
 0x2d2   :  { %963 = vmatpush3.bf16.msra.mxu1 %v329_v62  ;;  %v1075_v62 = vld [vmem:[#allocation2 + $0x64] sm:$0xff]  }
 0x2d3   :  { %v310_v63 = vpop.f32.mrb[16].mxu0  ;;  %964 = vmatprep.subr.bf16.mxu1 %v1111_v0 }
 0x2d4   :  { %v956_v1 = vpop.f32.mrb[17].mxu0  ;;  %v326_v3 = vmax.f32 %v310_v63, 0.0  ;;  %v1076_v63 = vld [vmem:[#allocation2 + $0x6c] sm:$0xff]  }
 0x2d5   :  { %v313_v2 = vpop.f32.mrb[18].mxu0  ;;  %v1077_v1 = vld [vmem:[#allocation2 + $0x74] ss:$0 sps:$4 sm:$0xff]  }
 0x2d6   :  { %v327_v4 = vmax.f32 %v313_v2, 0.0  ;;  %v957_v5 = vpop.f32.mrb[19].mxu0 }
 0x2d8   :  { %v330_v6 = vpack.c.bf16 %v327_v4, %v326_v3 }
 0x2da   :  { %965 = vmatpush3.bf16.msra.mxu1 %v330_v6 }
 0x2db   :  { %v318_v7 = vpop.f32.mrb[20].mxu0  ;;  %966 = vmatprep.subr.bf16.mxu1 %v1111_v0 }
 0x2dc   :  { %v328_v8 = vmax.f32 %v318_v7, 0.0  ;;  %v960_v9 = vpop.f32.mrb[21].mxu0 }
 0x2dd   :  { %v321_v10 = vpop.f32.mrb[22].mxu0 }
 0x2de   :  { %v331_v11 = vpack.c.bf16 %v328_v8, %v328_v8  ;;  %v961_v12 = vpop.f32.mrb[23].mxu0 }
 0x2e0   :  { %v361_v13 = vsel %vm74_vm1, %v331_v11, 0 }
 0x2e1   :  { %967 = vmatpush3.bf16.msra.mxu1 %v361_v13 }
 0x2e2   :  { %998 = vmatprep.subr.bf16.mxu1 %v1111_v0 }
 0x2e4   :  { %969 = vmatmul.mubr.msk.bf16.vlgmr.msra.gmra.mrb[12].mxu1 %vm64_vm2, %v1069_v14 }
 0x2e5   :  { %972 = vmatprep.mubr.msk.bf16.mxu1 %vm1112_vm0, %v1111_v0 }
 0x2ec   :  { %973 = vmatmul.mubr.msk.bf16.gmra.mrb[16].mxu1 %vm64_vm2, %v1070_v15 }
 0x2ed   :  { %976 = vmatprep.mubr.msk.bf16.mxu1 %vm1112_vm0, %v1111_v0 }
 0x2f4   :  { %977 = vmatmul.mubr.msk.bf16.gmra.mrb[20].mxu1 %vm64_vm2, %v1071_v16 }
 0x2f5   :  { %1004 = vmatprep.mubr.msk.bf16.mxu1 %vm1112_vm0, %v1111_v0 }
 0x3b7   :  { %v397_v17 = vpop.f32.mrb[12].mxu1 }
 0x3b8   :  { %v970_v18 = vpop.f32.mrb[13].mxu1  ;;  %v419_v20 = vmax.f32 %v397_v17, 0.0 }
 0x3b9   :  { %v400_v19 = vpop.f32.mrb[14].mxu1 }
 0x3ba   :  { %v420_v21 = vmax.f32 %v400_v19, 0.0  ;;  %v971_v22 = vpop.f32.mrb[15].mxu1 }
 0x3bc   :  { %v424_v23 = vpack.c.bf16 %v420_v21, %v419_v20 }
 0x3be   :  { %981 = vmatpush3.bf16.msra.mxu0 %v424_v23  ;;  %v1078_v23 = vld [vmem:[#allocation2 + $0x78] sm:$0xff]  }
 0x3bf   :  { %v405_v24 = vpop.f32.mrb[16].mxu1  ;;  %982 = vmatprep.subr.bf16.mxu0 %v1111_v0 }
 0x3c0   :  { %v974_v25 = vpop.f32.mrb[17].mxu1  ;;  %v421_v27 = vmax.f32 %v405_v24, 0.0  ;;  %v1079_v24 = vld [vmem:[#allocation2 + $0x80] sm:$0xff]  }
 0x3c1   :  { %v408_v26 = vpop.f32.mrb[18].mxu1  ;;  %v1080_v25 = vld [vmem:[#allocation2 + $0x88] ss:$0 sps:$4 sm:$0xff]  }
 0x3c2   :  { %v422_v28 = vmax.f32 %v408_v26, 0.0  ;;  %v975_v29 = vpop.f32.mrb[19].mxu1 }
 0x3c4   :  { %v425_v30 = vpack.c.bf16 %v422_v28, %v421_v27 }
 0x3c6   :  { %983 = vmatpush3.bf16.msra.mxu0 %v425_v30 }
 0x3c7   :  { %v413_v31 = vpop.f32.mrb[20].mxu1  ;;  %984 = vmatprep.subr.bf16.mxu0 %v1111_v0 }
 0x3c8   :  { %v423_v32 = vmax.f32 %v413_v31, 0.0  ;;  %v978_v33 = vpop.f32.mrb[21].mxu1 }
 0x3c9   :  { %v416_v34 = vpop.f32.mrb[22].mxu1 }
 0x3ca   :  { %v426_v35 = vpack.c.bf16 %v423_v32, %v423_v32  ;;  %v979_v36 = vpop.f32.mrb[23].mxu1 }
 0x3cc   :  { %v456_v37 = vsel %vm74_vm1, %v426_v35, 0 }
 0x3cd   :  { %985 = vmatpush3.bf16.msra.mxu0 %v456_v37 }
 0x3ce   :  { %1016 = vmatprep.subr.bf16.mxu0 %v1111_v0 }
 0x3d0   :  { %987 = vmatmul.mubr.msk.bf16.vlgmr.msra.gmra.mrb[24].mxu0 %vm64_vm2, %v1072_v38 }
 0x3d1   :  { %990 = vmatprep.mubr.msk.bf16.mxu0 %vm1112_vm0, %v1111_v0 }
 0x3d8   :  { %991 = vmatmul.mubr.msk.bf16.gmra.mrb[28].mxu0 %vm64_vm2, %v1073_v39 }
 0x3d9   :  { %994 = vmatprep.mubr.msk.bf16.mxu0 %vm1112_vm0, %v1111_v0 }
 0x3e0   :  { %995 = vmatmul.mubr.msk.bf16.gmra.mrb[32].mxu0 %vm64_vm2, %v1074_v40 }
 0x3e1   :  { %1022 = vmatprep.mubr.msk.bf16.mxu0 %vm1112_vm0, %v1111_v0 }
 0x4a3   :  { %v492_v41 = vpop.f32.mrb[24].mxu0 }
 0x4a4   :  { %v988_v42 = vpop.f32.mrb[25].mxu0  ;;  %v514_v44 = vmax.f32 %v492_v41, 0.0 }
 0x4a5   :  { %v495_v43 = vpop.f32.mrb[26].mxu0 }
 0x4a6   :  { %v515_v45 = vmax.f32 %v495_v43, 0.0  ;;  %v989_v46 = vpop.f32.mrb[27].mxu0 }
 0x4a8   :  { %v519_v47 = vpack.c.bf16 %v515_v45, %v514_v44 }
 0x4aa   :  { %999 = vmatpush3.bf16.msra.mxu1 %v519_v47  ;;  %v1081_v47 = vld [vmem:[#allocation2 + $0x8c] sm:$0xff]  }
 0x4ab   :  { %v500_v48 = vpop.f32.mrb[28].mxu0  ;;  %1000 = vmatprep.subr.bf16.mxu1 %v1111_v0 }
 0x4ac   :  { %v992_v49 = vpop.f32.mrb[29].mxu0  ;;  %v516_v51 = vmax.f32 %v500_v48, 0.0  ;;  %v1082_v48 = vld [vmem:[#allocation2 + $0x94] sm:$0xff]  }
 0x4ad   :  { %v503_v50 = vpop.f32.mrb[30].mxu0  ;;  %v1083_v49 = vld [vmem:[#allocation2 + $0x9c] ss:$0 sps:$4 sm:$0xff]  }
 0x4ae   :  { %v517_v52 = vmax.f32 %v503_v50, 0.0  ;;  %v993_v53 = vpop.f32.mrb[31].mxu0 }
 0x4b0   :  { %v520_v54 = vpack.c.bf16 %v517_v52, %v516_v51 }
 0x4b2   :  { %1001 = vmatpush3.bf16.msra.mxu1 %v520_v54 }
 0x4b3   :  { %v508_v55 = vpop.f32.mrb[32].mxu0  ;;  %1002 = vmatprep.subr.bf16.mxu1 %v1111_v0 }
 0x4b4   :  { %v518_v56 = vmax.f32 %v508_v55, 0.0  ;;  %v996_v57 = vpop.f32.mrb[33].mxu0 }
 0x4b5   :  { %v511_v58 = vpop.f32.mrb[34].mxu0 }
 0x4b6   :  { %v521_v59 = vpack.c.bf16 %v518_v56, %v518_v56  ;;  %v997_v60 = vpop.f32.mrb[35].mxu0 }
 0x4b8   :  { %v551_v61 = vsel %vm74_vm1, %v521_v59, 0 }
 0x4b9   :  { %1003 = vmatpush3.bf16.msra.mxu1 %v551_v61 }
 0x4ba   :  { %1034 = vmatprep.subr.bf16.mxu1 %v1111_v0 }
 0x4bc   :  { %1005 = vmatmul.mubr.msk.bf16.vlgmr.msra.gmra.mrb[24].mxu1 %vm64_vm2, %v1075_v62 }
 0x4bd   :  { %1008 = vmatprep.mubr.msk.bf16.mxu1 %vm1112_vm0, %v1111_v0 }
 0x4c4   :  { %1009 = vmatmul.mubr.msk.bf16.gmra.mrb[28].mxu1 %vm64_vm2, %v1076_v63 }
 0x4c5   :  { %1012 = vmatprep.mubr.msk.bf16.mxu1 %vm1112_vm0, %v1111_v0 }
 0x4cc   :  { %1013 = vmatmul.mubr.msk.bf16.gmra.mrb[32].mxu1 %vm64_vm2, %v1077_v1 }
 0x4cd   :  { %1040 = vmatprep.mubr.msk.bf16.mxu1 %vm1112_vm0, %v1111_v0 }
 0x58f   :  { %v587_v2 = vpop.f32.mrb[24].mxu1 }
 0x590   :  { %v1006_v3 = vpop.f32.mrb[25].mxu1  ;;  %v609_v5 = vmax.f32 %v587_v2, 0.0 }
 0x591   :  { %v590_v4 = vpop.f32.mrb[26].mxu1 }
 0x592   :  { %v610_v6 = vmax.f32 %v590_v4, 0.0  ;;  %v1007_v7 = vpop.f32.mrb[27].mxu1 }
 0x594   :  { %v614_v8 = vpack.c.bf16 %v610_v6, %v609_v5 }
 0x596   :  { %1017 = vmatpush3.bf16.msra.mxu0 %v614_v8 }
 0x597   :  { %v595_v9 = vpop.f32.mrb[28].mxu1  ;;  %1018 = vmatprep.subr.bf16.mxu0 %v1111_v0 }
 0x598   :  { %v1010_v10 = vpop.f32.mrb[29].mxu1  ;;  %v611_v12 = vmax.f32 %v595_v9, 0.0 }
 0x599   :  { %v598_v11 = vpop.f32.mrb[30].mxu1 }
 0x59a   :  { %v612_v13 = vmax.f32 %v598_v11, 0.0  ;;  %v1011_v14 = vpop.f32.mrb[31].mxu1 }
 0x59c   :  { %v615_v15 = vpack.c.bf16 %v612_v13, %v611_v12 }
 0x59e   :  { %1019 = vmatpush3.bf16.msra.mxu0 %v615_v15 }
 0x59f   :  { %v603_v16 = vpop.f32.mrb[32].mxu1  ;;  %1020 = vmatprep.subr.bf16.mxu0 %v1111_v0 }
 0x5a0   :  { %v613_v17 = vmax.f32 %v603_v16, 0.0  ;;  %v1014_v18 = vpop.f32.mrb[33].mxu1 }
 0x5a1   :  { %v606_v19 = vpop.f32.mrb[34].mxu1 }
 0x5a2   :  { %v616_v20 = vpack.c.bf16 %v613_v17, %v613_v17  ;;  %v1015_v21 = vpop.f32.mrb[35].mxu1 }
 0x5a4   :  { %v646_v22 = vsel %vm74_vm1, %v616_v20, 0 }
 0x5a5   :  { %1021 = vmatpush3.bf16.msra.mxu0 %v646_v22 }
 0x5a8   :  { %1023 = vmatmul.mubr.msk.bf16.vlgmr.msra.gmra.mrb[36].mxu0 %vm64_vm2, %v1078_v23 }
 0x5a9   :  { %1026 = vmatprep.mubr.msk.bf16.mxu0 %vm1112_vm0, %v1111_v0 }
 0x5b0   :  { %1027 = vmatmul.mubr.msk.bf16.gmra.mrb[40].mxu0 %vm64_vm2, %v1079_v24 }
 0x5b1   :  { %1030 = vmatprep.mubr.msk.bf16.mxu0 %vm1112_vm0, %v1111_v0 }
 0x5b8   :  { %1031 = vmatmul.mubr.msk.bf16.gmra.mrb[44].mxu0 %vm64_vm2, %v1080_v25 }
 0x67b   :  { %v682_v26 = vpop.f32.mrb[36].mxu0 }
 0x67c   :  { %v1024_v27 = vpop.f32.mrb[37].mxu0  ;;  %v704_v29 = vmax.f32 %v682_v26, 0.0 }
 0x67d   :  { %v685_v28 = vpop.f32.mrb[38].mxu0 }
 0x67e   :  { %v705_v30 = vmax.f32 %v685_v28, 0.0  ;;  %v1025_v31 = vpop.f32.mrb[39].mxu0 }
 0x680   :  { %v709_v32 = vpack.c.bf16 %v705_v30, %v704_v29 }
 0x682   :  { %1035 = vmatpush3.bf16.msra.mxu1 %v709_v32 }
 0x683   :  { %v690_v33 = vpop.f32.mrb[40].mxu0  ;;  %1036 = vmatprep.subr.bf16.mxu1 %v1111_v0 }
 0x684   :  { %v1028_v34 = vpop.f32.mrb[41].mxu0  ;;  %v706_v36 = vmax.f32 %v690_v33, 0.0 }
 0x685   :  { %v693_v35 = vpop.f32.mrb[42].mxu0 }
 0x686   :  { %v707_v37 = vmax.f32 %v693_v35, 0.0  ;;  %v1029_v38 = vpop.f32.mrb[43].mxu0 }
 0x688   :  { %v710_v39 = vpack.c.bf16 %v707_v37, %v706_v36 }
 0x68a   :  { %1037 = vmatpush3.bf16.msra.mxu1 %v710_v39 }
 0x68b   :  { %v698_v40 = vpop.f32.mrb[44].mxu0  ;;  %1038 = vmatprep.subr.bf16.mxu1 %v1111_v0 }
 0x68c   :  { %v708_v41 = vmax.f32 %v698_v40, 0.0  ;;  %v1032_v42 = vpop.f32.mrb[45].mxu0 }
 0x68d   :  { %v701_v43 = vpop.f32.mrb[46].mxu0 }
 0x68e   :  { %v711_v44 = vpack.c.bf16 %v708_v41, %v708_v41  ;;  %v1033_v45 = vpop.f32.mrb[47].mxu0 }
 0x690   :  { %v741_v46 = vsel %vm74_vm1, %v711_v44, 0 }
 0x691   :  { %1039 = vmatpush3.bf16.msra.mxu1 %v741_v46 }
 0x694   :  { %1041 = vmatmul.mubr.msk.bf16.vlgmr.msra.gmra.mrb[36].mxu1 %vm64_vm2, %v1081_v47 }
 0x695   :  { %1044 = vmatprep.mubr.msk.bf16.mxu1 %vm1112_vm0, %v1111_v0 }
 0x69c   :  { %1045 = vmatmul.mubr.msk.bf16.gmra.mrb[40].mxu1 %vm64_vm2, %v1082_v48 }
 0x69d   :  { %1048 = vmatprep.mubr.msk.bf16.mxu1 %vm1112_vm0, %v1111_v0 }
 0x6a4   :  { %1049 = vmatmul.mubr.msk.bf16.gmra.mrb[44].mxu1 %vm64_vm2, %v1083_v49 }
 0x767   :  { %v777_v50 = vpop.f32.mrb[36].mxu1 }
 0x768   :  { %799 = vst [vmem:[%s1270_s2] sm:$0xff] %v777_v50  ;;  %v1042_v51 = vpop.f32.mrb[37].mxu1 }
 0x769   :  { %v780_v52 = vpop.f32.mrb[38].mxu1 }
 0x76a   :  { %800 = vst [vmem:[%s1270_s2 + $0x8] sm:$0xff] %v780_v52  ;;  %v1043_v53 = vpop.f32.mrb[39].mxu1 }
 0x76f   :  { %v785_v54 = vpop.f32.mrb[40].mxu1 }
 0x770   :  { %801 = vst [vmem:[%s1270_s2 + $0x10] sm:$0xff] %v785_v54  ;;  %v1046_v0 = vpop.f32.mrb[41].mxu1 }
 0x771   :  { %v788_v55 = vpop.f32.mrb[42].mxu1 }
 0x772   :  { %802 = vst [vmem:[%s1270_s2 + $0x18] sm:$0xff] %v788_v55  ;;  %v1047_v56 = vpop.f32.mrb[43].mxu1 }
 0x777   :  { %v793_v57 = vpop.f32.mrb[44].mxu1 }
 0x778   :  { %803 = vst [vmem:[%s1270_s2 + $0x20] sm:$0xff] %v793_v57  ;;  %v1050_v58 = vpop.f32.mrb[45].mxu1 }
 0x779   :  { %v796_v59 = vpop.f32.mrb[46].mxu1 }
 0x77a   :  { %v1051_v60 = vpop.f32.mrb[47].mxu1 }
 0x77b   :  { %808 = vsyncpa [#allocation3], 1 }

</bundles_post_ra>
